<compile_context>
chip_gen: v7x
topology: tpu7x:2x2x1
jax: 0.10.0
libtpu: 0.0.40
codegen_flags: <defaults>
</compile_context>

<pallas_src>
import functools

import jax
import jax.numpy as jnp
from jax import lax
from jax.experimental import pallas as pl
from jax.experimental.pallas import tpu as pltpu


def _round_up(x, m):
    return (x + m - 1) // m * m


_TB_CAP = 512  # rows per batch tile (VMEM use stays ~1-2 MiB, far under limits)


def _choose_batch_tile(batch):
    """Pick (tile_rows, padded_rows): big tiles, >=2 grid points when possible."""
    rows = _round_up(max(batch, 1), 8)
    if rows <= 8:
        return 8, rows                       # trivially small batch, grid=(1,)
    # ~half the batch per tile -> grid >= 2 (v7x megacore) with minimal padding.
    tb = min(_round_up((rows + 1) // 2, 8), _TB_CAP)
    return tb, _round_up(rows, tb)


def _vae_kernel(inp_ref, w_ref, b_ref, out_ref, *,
                n_hidden, latent_dim, mu_start, lv_start):
    """Fused VAE forward on one batch tile (uniform 128-lane padded layers)."""
    f32 = jnp.float32
    bf16 = jnp.bfloat16

    def linear(h, layer):
        # bf16 operands on the MXU, f32 accumulation, f32 bias add.
        return jnp.dot(h.astype(bf16), w_ref[layer],
                       preferred_element_type=f32) + b_ref[layer]

    inp = inp_ref[...]                       # bf16 [TB, PAD]: x | 0 | eps | 0

    # ---- encoder: (Linear -> ReLU) * n_hidden ----
    # (eps lanes are inert here: the first weight's rows there are zero.)
    h = inp
    for l in range(n_hidden):
        h = jnp.maximum(linear(h, l), 0.0)

    # ---- fused mu/logvar head: mu @ [mu_start,+L), logvar @ [lv_start,+L) ----
    hh = linear(h, n_hidden)

    lane = lax.broadcasted_iota(jnp.int32, hh.shape, 1)
    is_mu = jnp.logical_and(lane >= mu_start, lane < mu_start + latent_dim)
    is_lv = jnp.logical_and(lane >= lv_start, lane < lv_start + latent_dim)

    # std on the logvar lanes; exp(0)=1 elsewhere is harmless (eps is 0 there).
    std = jnp.exp(0.5 * jnp.where(is_lv, hh, 0.0))
    eps = jnp.where(is_lv, inp.astype(f32), 0.0)     # eps shares logvar lanes
    # z lanes: [mu_start,+L) = mu, [lv_start,+L) = eps*std.  The first decoder
    # weight has its rows duplicated at BOTH ranges, so
    #   z_split @ Wd1 == (mu + eps*std) @ Wd1.
    z_split = jnp.where(is_mu, hh, 0.0) + eps * std

    # ---- decoder: (Linear -> ReLU) * n_hidden -> Linear ----
    d = z_split
    for l in range(n_hidden + 1, 2 * n_hidden + 1):
        d = jnp.maximum(linear(d, l), 0.0)
    recon = linear(d, 2 * n_hidden + 1)      # lanes [0,input_dim), exact 0 after

    # ---- single lane-dense packed output row: recon | mu | logvar ----
    keep_hh = jnp.logical_and(lane >= mu_start, lane < lv_start + latent_dim)
    out_ref[...] = recon + jnp.where(keep_hh, hh, 0.0)


@functools.partial(jax.jit, static_argnames=("input_dim", "latent_dim", "n_hidden"))
def vae_forward(x, eps, w_packed, b_packed, *, input_dim, latent_dim, n_hidden):
    """Runs the fused VAE forward pass. Returns (recon, mu, logvar)."""
    B = x.shape[0]
    L_layers, PAD, _ = w_packed.shape
    mu_start = input_dim
    lv_start = input_dim + latent_dim
    assert lv_start + latent_dim <= PAD, "input_dim + 2*latent_dim must fit PAD"

    tb, b_rows = _choose_batch_tile(B)

    # One packed bf16 input slab (x and eps share the tile; single DMA stream).
    inp = jnp.zeros((b_rows, PAD), jnp.bfloat16)
    inp = inp.at[:B, :input_dim].set(x.astype(jnp.bfloat16))
    inp = inp.at[:B, lv_start:lv_start + latent_dim].set(eps.astype(jnp.bfloat16))

    cost = pl.CostEstimate(
        flops=2 * b_rows * PAD * PAD * L_layers,
        transcendentals=b_rows * PAD,
        bytes_accessed=(inp.size * 2 + w_packed.size * 2
                        + b_packed.size * 4 + b_rows * PAD * 4),
    )

    out = pl.pallas_call(
        functools.partial(_vae_kernel, n_hidden=n_hidden, latent_dim=latent_dim,
                          mu_start=mu_start, lv_start=lv_start),
        out_shape=jax.ShapeDtypeStruct((b_rows, PAD), jnp.float32),
        grid=(b_rows // tb,),
        in_specs=[
            pl.BlockSpec((tb, PAD), lambda i: (i, 0)),           # packed x|eps tile
            pl.BlockSpec((L_layers, PAD, PAD), lambda i: (0, 0, 0)),  # weights (resident)
            pl.BlockSpec((L_layers, 1, PAD), lambda i: (0, 0, 0)),    # biases (resident)
        ],
        out_specs=pl.BlockSpec((tb, PAD), lambda i: (i, 0)),
        compiler_params=pltpu.CompilerParams(
            dimension_semantics=("parallel",)),
        cost_estimate=cost,
    )(inp, w_packed, b_packed)

    recon = out[:B, :input_dim]
    mu = out[:B, mu_start:mu_start + latent_dim]
    logvar = out[:B, lv_start:lv_start + latent_dim]
    return recon, mu, logvar


def init_params(key, input_dim, latent_dim=16, hidden_dims=(128, 64)):
    """Deterministic synthetic init matching the PyTorch module's layer shapes.

    Weights stored as [in, out] (transpose of nn.Linear layout, same math);
    biases as [out].
    """
    def linear(k, d_in, d_out):
        kw, kb = jax.random.split(k)
        scale = 1.0 / jnp.sqrt(jnp.float32(d_in))
        w = jax.random.uniform(kw, (d_in, d_out), jnp.float32, -scale, scale)
        b = jax.random.uniform(kb, (d_out,), jnp.float32, -scale, scale)
        return w, b

    n_h = len(hidden_dims)
    keys = iter(jax.random.split(key, 2 * n_h + 3))
    enc, dec = [], []
    last = input_dim
    for h in hidden_dims:
        enc.append(linear(next(keys), last, h))
        last = h
    fc_mu = linear(next(keys), last, latent_dim)
    fc_logvar = linear(next(keys), last, latent_dim)
    last = latent_dim
    for h in reversed(hidden_dims):
        dec.append(linear(next(keys), last, h))
        last = h
    dec.append(linear(next(keys), last, input_dim))
    return {"enc": enc, "mu": fc_mu, "logvar": fc_logvar, "dec": dec}


def pack_params(params, input_dim, latent_dim, hidden_dims):
    """Pack all layers into one zero-padded bf16 weight stack + f32 bias stack."""
    n_h = len(hidden_dims)
    L = 2 * n_h + 2
    mu_start = input_dim
    lv_start = input_dim + latent_dim
    dims = [input_dim, *hidden_dims, lv_start + latent_dim, *reversed(hidden_dims)]
    PAD = _round_up(max(max(dims), 128), 128)

    W = jnp.zeros((L, PAD, PAD), jnp.float32)
    Bv = jnp.zeros((L, 1, PAD), jnp.float32)

    # encoder layers
    for i, (w, b) in enumerate(params["enc"]):
        W = W.at[i, :w.shape[0], :w.shape[1]].set(w)
        Bv = Bv.at[i, 0, :b.shape[0]].set(b)

    # fused heads: mu -> lanes [mu_start,+L), logvar -> lanes [lv_start,+L)
    w_mu, b_mu = params["mu"]
    w_lv, b_lv = params["logvar"]
    hl = n_h
    W = W.at[hl, :w_mu.shape[0], mu_start:mu_start + latent_dim].set(w_mu)
    W = W.at[hl, :w_lv.shape[0], lv_start:lv_start + latent_dim].set(w_lv)
    Bv = Bv.at[hl, 0, mu_start:mu_start + latent_dim].set(b_mu)
    Bv = Bv.at[hl, 0, lv_start:lv_start + latent_dim].set(b_lv)

    # decoder layers; the first one gets its rows duplicated at the mu lanes and
    # the eps*std lanes so that z_split @ Wdup == (mu + eps*std) @ Wd1.
    for j, (w, b) in enumerate(params["dec"]):
        l = n_h + 1 + j
        if j == 0:
            W = W.at[l, mu_start:mu_start + latent_dim, :w.shape[1]].set(w)
            W = W.at[l, lv_start:lv_start + latent_dim, :w.shape[1]].set(w)
        else:
            W = W.at[l, :w.shape[0], :w.shape[1]].set(w)
        Bv = Bv.at[l, 0, :b.shape[0]].set(b)

    return W.astype(jnp.bfloat16), Bv


def reference_forward(x, eps, params):
    """Pure-JAX reference (bf16 matmuls with f32 accumulation, like the kernel)."""
    def lin(h, wb):
        w, b = wb
        return jnp.dot(h.astype(jnp.bfloat16), w.astype(jnp.bfloat16),
                       preferred_element_type=jnp.float32) + b

    h = x
    for wb in params["enc"]:
        h = jnp.maximum(lin(h, wb), 0.0)
    mu = lin(h, params["mu"])
    logvar = lin(h, params["logvar"])
    z = mu + eps * jnp.exp(0.5 * logvar)
    d = z
    for wb in params["dec"][:-1]:
        d = jnp.maximum(lin(d, wb), 0.0)
    recon = lin(d, params["dec"][-1])
    return recon, mu, logvar


if __name__ == "__main__":
    INPUT_DIM = 32
    LATENT_DIM = 16
    HIDDEN_DIMS = (128, 64)
    BATCH = 8

    root = jax.random.PRNGKey(0)
    k_params, k_x, k_eps = jax.random.split(root, 3)

    params = init_params(k_params, INPUT_DIM, LATENT_DIM, HIDDEN_DIMS)
    w_packed, b_packed = pack_params(params, INPUT_DIM, LATENT_DIM, HIDDEN_DIMS)

    x = jax.random.normal(k_x, (BATCH, INPUT_DIM), jnp.float32)
    # eps is the "torch.randn_like(std)" draw, generated on the host so the
    # kernel is deterministic given its inputs.
    eps = jax.random.normal(k_eps, (BATCH, LATENT_DIM), jnp.float32)

    recon, mu, logvar = vae_forward(
        x, eps, w_packed, b_packed,
        input_dim=INPUT_DIM, latent_dim=LATENT_DIM, n_hidden=len(HIDDEN_DIMS))
    jax.block_until_ready((recon, mu, logvar))

    r_ref, m_ref, lv_ref = reference_forward(x, eps, params)
    assert recon.shape == (BATCH, INPUT_DIM)
    assert mu.shape == (BATCH, LATENT_DIM) and logvar.shape == (BATCH, LATENT_DIM)
    assert jnp.allclose(mu, m_ref, atol=1e-3, rtol=1e-3)
    assert jnp.allclose(logvar, lv_ref, atol=1e-3, rtol=1e-3)
    # recon differs from the reference only by (a) bf16 rounding of eps and
    # (b) rounding (mu) and (eps*std) to bf16 separately instead of their f32
    # sum (the reparameterize add is folded into the first decoder matmul),
    # hence the slightly looser tolerance.
    assert jnp.allclose(recon, r_ref, atol=3e-2, rtol=3e-2)

    print("KERNEL_OK")
</pallas_src>

<mosaic_0001>
module attributes {stable_mosaic.version = 11 : i64} {
  func.func @_vae_kernel(%arg0: i32, %arg1: memref<8x128xbf16, #tpu.memory_space<vmem>>, %arg2: memref<6x128x128xbf16, #tpu.memory_space<vmem>>, %arg3: memref<6x1x128xf32, #tpu.memory_space<vmem>>, %arg4: memref<8x128xf32, #tpu.memory_space<vmem>>) attributes {dimension_semantics = [#tpu.dimension_semantics<parallel>], iteration_bounds = array<i64: 1>, scalar_prefetch = 0 : i64, scratch_operands = 0 : i64, tpu.core_type = #tpu.core_type<tc>, window_params = [{transform_indices = @transform_0, window_bounds = array<i64: 8, 128>}, {pipeline_mode = #tpu.pipeline_mode<synchronous>, transform_indices = @transform_1, window_bounds = array<i64: 6, 128, 128>}, {pipeline_mode = #tpu.pipeline_mode<synchronous>, transform_indices = @transform_2, window_bounds = array<i64: 6, 1, 128>}, {transform_indices = @transform_3, window_bounds = array<i64: 8, 128>}]} {
    %c0 = arith.constant 0 : index
    %c0_0 = arith.constant 0 : index
    %0 = vector.load %arg1[%c0, %c0_0] : memref<8x128xbf16, #tpu.memory_space<vmem>>, vector<8x128xbf16>
    %c0_1 = arith.constant 0 : index
    %c0_2 = arith.constant 0 : index
    %c0_3 = arith.constant 0 : index
    %1 = vector.load %arg2[%c0_1, %c0_2, %c0_3] : memref<6x128x128xbf16, #tpu.memory_space<vmem>>, vector<1x128x128xbf16>
    %2 = vector.shape_cast %1 : vector<1x128x128xbf16> to vector<128x128xbf16>
    %cst = arith.constant dense<0.000000e+00> : vector<8x128xf32>
    %3 = tpu.matmul %0, %2, %cst {dimension_numbers = #tpu.dot_dimension_numbers<[1], [0], [0], [1], [0, 0, 1, 1], [], []>} : vector<8x128xbf16>, vector<128x128xbf16>, vector<8x128xf32> -> vector<8x128xf32>
    %c0_4 = arith.constant 0 : index
    %c0_5 = arith.constant 0 : index
    %c0_6 = arith.constant 0 : index
    %4 = vector.load %arg3[%c0_4, %c0_5, %c0_6] : memref<6x1x128xf32, #tpu.memory_space<vmem>>, vector<1x1x128xf32>
    %5 = vector.shape_cast %4 : vector<1x1x128xf32> to vector<1x128xf32>
    %6 = vector.broadcast %5 : vector<1x128xf32> to vector<8x128xf32>
    %7 = arith.addf %3, %6 : vector<8x128xf32>
    %cst_7 = arith.constant 0.000000e+00 : f32
    %8 = vector.broadcast %cst_7 : f32 to vector<8x128xf32>
    %9 = arith.maximumf %7, %8 : vector<8x128xf32>
    %10 = arith.truncf %9 : vector<8x128xf32> to vector<8x128xbf16>
    %c1 = arith.constant 1 : index
    %c0_8 = arith.constant 0 : index
    %c0_9 = arith.constant 0 : index
    %11 = vector.load %arg2[%c1, %c0_8, %c0_9] : memref<6x128x128xbf16, #tpu.memory_space<vmem>>, vector<1x128x128xbf16>
    %12 = vector.shape_cast %11 : vector<1x128x128xbf16> to vector<128x128xbf16>
    %cst_10 = arith.constant dense<0.000000e+00> : vector<8x128xf32>
    %13 = tpu.matmul %10, %12, %cst_10 {dimension_numbers = #tpu.dot_dimension_numbers<[1], [0], [0], [1], [0, 0, 1, 1], [], []>} : vector<8x128xbf16>, vector<128x128xbf16>, vector<8x128xf32> -> vector<8x128xf32>
    %c1_11 = arith.constant 1 : index
    %c0_12 = arith.constant 0 : index
    %c0_13 = arith.constant 0 : index
    %14 = vector.load %arg3[%c1_11, %c0_12, %c0_13] : memref<6x1x128xf32, #tpu.memory_space<vmem>>, vector<1x1x128xf32>
    %15 = vector.shape_cast %14 : vector<1x1x128xf32> to vector<1x128xf32>
    %16 = vector.broadcast %15 : vector<1x128xf32> to vector<8x128xf32>
    %17 = arith.addf %13, %16 : vector<8x128xf32>
    %cst_14 = arith.constant 0.000000e+00 : f32
    %18 = vector.broadcast %cst_14 : f32 to vector<8x128xf32>
    %19 = arith.maximumf %17, %18 : vector<8x128xf32>
    %20 = arith.truncf %19 : vector<8x128xf32> to vector<8x128xbf16>
    %c2 = arith.constant 2 : index
    %c0_15 = arith.constant 0 : index
    %c0_16 = arith.constant 0 : index
    %21 = vector.load %arg2[%c2, %c0_15, %c0_16] : memref<6x128x128xbf16, #tpu.memory_space<vmem>>, vector<1x128x128xbf16>
    %22 = vector.shape_cast %21 : vector<1x128x128xbf16> to vector<128x128xbf16>
    %cst_17 = arith.constant dense<0.000000e+00> : vector<8x128xf32>
    %23 = tpu.matmul %20, %22, %cst_17 {dimension_numbers = #tpu.dot_dimension_numbers<[1], [0], [0], [1], [0, 0, 1, 1], [], []>} : vector<8x128xbf16>, vector<128x128xbf16>, vector<8x128xf32> -> vector<8x128xf32>
    %c2_18 = arith.constant 2 : index
    %c0_19 = arith.constant 0 : index
    %c0_20 = arith.constant 0 : index
    %24 = vector.load %arg3[%c2_18, %c0_19, %c0_20] : memref<6x1x128xf32, #tpu.memory_space<vmem>>, vector<1x1x128xf32>
    %25 = vector.shape_cast %24 : vector<1x1x128xf32> to vector<1x128xf32>
    %26 = vector.broadcast %25 : vector<1x128xf32> to vector<8x128xf32>
    %27 = arith.addf %23, %26 : vector<8x128xf32>
    %28 = tpu.iota {dimensions = array<i32: 1>} : vector<8x128xi32>
    %c32_i32 = arith.constant 32 : i32
    %29 = vector.broadcast %c32_i32 : i32 to vector<8x128xi32>
    %30 = arith.cmpi sge, %28, %29 : vector<8x128xi32>
    %c48_i32 = arith.constant 48 : i32
    %31 = vector.broadcast %c48_i32 : i32 to vector<8x128xi32>
    %32 = arith.cmpi slt, %28, %31 : vector<8x128xi32>
    %33 = arith.andi %30, %32 : vector<8x128xi1>
    %c48_i32_21 = arith.constant 48 : i32
    %34 = vector.broadcast %c48_i32_21 : i32 to vector<8x128xi32>
    %35 = arith.cmpi sge, %28, %34 : vector<8x128xi32>
    %c64_i32 = arith.constant 64 : i32
    %36 = vector.broadcast %c64_i32 : i32 to vector<8x128xi32>
    %37 = arith.cmpi slt, %28, %36 : vector<8x128xi32>
    %38 = arith.andi %35, %37 : vector<8x128xi1>
    %cst_22 = arith.constant 0.000000e+00 : f32
    %39 = vector.broadcast %cst_22 : f32 to vector<8x128xf32>
    %40 = arith.select %38, %27, %39 : vector<8x128xi1>, vector<8x128xf32>
    %cst_23 = arith.constant 5.000000e-01 : f32
    %41 = vector.broadcast %cst_23 : f32 to vector<8x128xf32>
    %42 = arith.mulf %41, %40 : vector<8x128xf32>
    %43 = math.exp %42 : vector<8x128xf32>
    %44 = arith.extf %0 : vector<8x128xbf16> to vector<8x128xf32>
    %cst_24 = arith.constant 0.000000e+00 : f32
    %45 = vector.broadcast %cst_24 : f32 to vector<8x128xf32>
    %46 = arith.select %38, %44, %45 : vector<8x128xi1>, vector<8x128xf32>
    %cst_25 = arith.constant 0.000000e+00 : f32
    %47 = vector.broadcast %cst_25 : f32 to vector<8x128xf32>
    %48 = arith.select %33, %27, %47 : vector<8x128xi1>, vector<8x128xf32>
    %49 = arith.mulf %46, %43 : vector<8x128xf32>
    %50 = arith.addf %48, %49 : vector<8x128xf32>
    %51 = arith.truncf %50 : vector<8x128xf32> to vector<8x128xbf16>
    %c3 = arith.constant 3 : index
    %c0_26 = arith.constant 0 : index
    %c0_27 = arith.constant 0 : index
    %52 = vector.load %arg2[%c3, %c0_26, %c0_27] : memref<6x128x128xbf16, #tpu.memory_space<vmem>>, vector<1x128x128xbf16>
    %53 = vector.shape_cast %52 : vector<1x128x128xbf16> to vector<128x128xbf16>
    %cst_28 = arith.constant dense<0.000000e+00> : vector<8x128xf32>
    %54 = tpu.matmul %51, %53, %cst_28 {dimension_numbers = #tpu.dot_dimension_numbers<[1], [0], [0], [1], [0, 0, 1, 1], [], []>} : vector<8x128xbf16>, vector<128x128xbf16>, vector<8x128xf32> -> vector<8x128xf32>
    %c3_29 = arith.constant 3 : index
    %c0_30 = arith.constant 0 : index
    %c0_31 = arith.constant 0 : index
    %55 = vector.load %arg3[%c3_29, %c0_30, %c0_31] : memref<6x1x128xf32, #tpu.memory_space<vmem>>, vector<1x1x128xf32>
    %56 = vector.shape_cast %55 : vector<1x1x128xf32> to vector<1x128xf32>
    %57 = vector.broadcast %56 : vector<1x128xf32> to vector<8x128xf32>
    %58 = arith.addf %54, %57 : vector<8x128xf32>
    %cst_32 = arith.constant 0.000000e+00 : f32
    %59 = vector.broadcast %cst_32 : f32 to vector<8x128xf32>
    %60 = arith.maximumf %58, %59 : vector<8x128xf32>
    %61 = arith.truncf %60 : vector<8x128xf32> to vector<8x128xbf16>
    %c4 = arith.constant 4 : index
    %c0_33 = arith.constant 0 : index
    %c0_34 = arith.constant 0 : index
    %62 = vector.load %arg2[%c4, %c0_33, %c0_34] : memref<6x128x128xbf16, #tpu.memory_space<vmem>>, vector<1x128x128xbf16>
    %63 = vector.shape_cast %62 : vector<1x128x128xbf16> to vector<128x128xbf16>
    %cst_35 = arith.constant dense<0.000000e+00> : vector<8x128xf32>
    %64 = tpu.matmul %61, %63, %cst_35 {dimension_numbers = #tpu.dot_dimension_numbers<[1], [0], [0], [1], [0, 0, 1, 1], [], []>} : vector<8x128xbf16>, vector<128x128xbf16>, vector<8x128xf32> -> vector<8x128xf32>
    %c4_36 = arith.constant 4 : index
    %c0_37 = arith.constant 0 : index
    %c0_38 = arith.constant 0 : index
    %65 = vector.load %arg3[%c4_36, %c0_37, %c0_38] : memref<6x1x128xf32, #tpu.memory_space<vmem>>, vector<1x1x128xf32>
    %66 = vector.shape_cast %65 : vector<1x1x128xf32> to vector<1x128xf32>
    %67 = vector.broadcast %66 : vector<1x128xf32> to vector<8x128xf32>
    %68 = arith.addf %64, %67 : vector<8x128xf32>
    %cst_39 = arith.constant 0.000000e+00 : f32
    %69 = vector.broadcast %cst_39 : f32 to vector<8x128xf32>
    %70 = arith.maximumf %68, %69 : vector<8x128xf32>
    %71 = arith.truncf %70 : vector<8x128xf32> to vector<8x128xbf16>
    %c5 = arith.constant 5 : index
    %c0_40 = arith.constant 0 : index
    %c0_41 = arith.constant 0 : index
    %72 = vector.load %arg2[%c5, %c0_40, %c0_41] : memref<6x128x128xbf16, #tpu.memory_space<vmem>>, vector<1x128x128xbf16>
    %73 = vector.shape_cast %72 : vector<1x128x128xbf16> to vector<128x128xbf16>
    %cst_42 = arith.constant dense<0.000000e+00> : vector<8x128xf32>
    %74 = tpu.matmul %71, %73, %cst_42 {dimension_numbers = #tpu.dot_dimension_numbers<[1], [0], [0], [1], [0, 0, 1, 1], [], []>} : vector<8x128xbf16>, vector<128x128xbf16>, vector<8x128xf32> -> vector<8x128xf32>
    %c5_43 = arith.constant 5 : index
    %c0_44 = arith.constant 0 : index
    %c0_45 = arith.constant 0 : index
    %75 = vector.load %arg3[%c5_43, %c0_44, %c0_45] : memref<6x1x128xf32, #tpu.memory_space<vmem>>, vector<1x1x128xf32>
    %76 = vector.shape_cast %75 : vector<1x1x128xf32> to vector<1x128xf32>
    %77 = vector.broadcast %76 : vector<1x128xf32> to vector<8x128xf32>
    %78 = arith.addf %74, %77 : vector<8x128xf32>
    %c32_i32_46 = arith.constant 32 : i32
    %79 = vector.broadcast %c32_i32_46 : i32 to vector<8x128xi32>
    %80 = arith.cmpi sge, %28, %79 : vector<8x128xi32>
    %c64_i32_47 = arith.constant 64 : i32
    %81 = vector.broadcast %c64_i32_47 : i32 to vector<8x128xi32>
    %82 = arith.cmpi slt, %28, %81 : vector<8x128xi32>
    %83 = arith.andi %80, %82 : vector<8x128xi1>
    %cst_48 = arith.constant 0.000000e+00 : f32
    %84 = vector.broadcast %cst_48 : f32 to vector<8x128xf32>
    %85 = arith.select %83, %27, %84 : vector<8x128xi1>, vector<8x128xf32>
    %86 = arith.addf %78, %85 : vector<8x128xf32>
    %c0_49 = arith.constant 0 : index
    %c0_50 = arith.constant 0 : index
    %87 = vector.load %arg4[%c0_49, %c0_50] : memref<8x128xf32, #tpu.memory_space<vmem>>, vector<8x128xf32>
    tpu.vector_store %arg4[%c0_49, %c0_50], %86 {strides = array<i32>} : memref<8x128xf32, #tpu.memory_space<vmem>>, vector<8x128xf32>,
    return
  }
  func.func @transform_0(%arg0: i32) -> (i32, i32) {
    %c0_i32 = arith.constant 0 : i32
    %c0_i32_0 = arith.constant 0 : i32
    return %arg0, %c0_i32 : i32, i32
  }
  func.func @transform_1(%arg0: i32) -> (i32, i32, i32) {
    %c0_i32 = arith.constant 0 : i32
    %c0_i32_0 = arith.constant 0 : i32
    %c0_i32_1 = arith.constant 0 : i32
    %c0_i32_2 = arith.constant 0 : i32
    return %c0_i32, %c0_i32_0, %c0_i32_1 : i32, i32, i32
  }
  func.func @transform_2(%arg0: i32) -> (i32, i32, i32) {
    %c0_i32 = arith.constant 0 : i32
    %c0_i32_0 = arith.constant 0 : i32
    %c0_i32_1 = arith.constant 0 : i32
    %c0_i32_2 = arith.constant 0 : i32
    return %c0_i32, %c0_i32_0, %c0_i32_1 : i32, i32, i32
  }
  func.func @transform_3(%arg0: i32) -> (i32, i32) {
    %c0_i32 = arith.constant 0 : i32
    %c0_i32_0 = arith.constant 0 : i32
    return %arg0, %c0_i32 : i32, i32
  }
}

</mosaic_0001>

<bundles_post_ra>
// kernel: vae_forward.1
= control target key start
LH: loop header
LB: loop body
LE: loop exit
PB: predicated region body
PF: predicated region fallthrough
CT: control target
= control target key end

     0   :  { %8 = vsyncpa [#allocation3], 0  ;;  %s1053_s12 = smov [#allocation2]   ;;  %s1195_s0 = inlined_call_operand.vmem [shape: bf16[8,128], index: 0, kind: input, shape index: {}]   ;;  %s1196_s1 = inlined_call_operand.hbm [shape: bf16[6,128,128], index: 1, kind: input, shape index: {}]   ;;  %s1197_s2 = inlined_call_operand.vmem [shape: f32[6,1,128], index: 2, kind: input, shape index: {}]   ;;  %s1198_s3 = inlined_call_operand.vmem [shape: f32[8,128], index: 3, kind: output, shape index: {}]  }
   0x1   :  { %s16_s13 = sshll.u32 %s1053_s12, 4  ;;  %s1029_s16 = scalar_lea.hbm %s1196_s1, 6144  ;;  %s17_s13 = int_to_ptr.vmem [resolvable:$true] %s16_s13 }
   0x2   :  { %p1030_p0 = scmp.ne.s32.totalorder %s1196_s1, %s1029_s16  ;;  %p1033_p1 = scmp.lt.u32.totalorder %s1029_s16, %s1196_s1 }
   0x4   :  { %p1035_p2 = pnand %p1033_p1, %p1030_p0 }
   0x6   :  { %1038 = shalt.err (!%p1035_p2)
}
   0x7   :  { %s1039_s21 = scalar_lea.vmem %s17_s13, 6144  ;;  %p1044_p4 = scmp.lt.s32.totalorder %s17_s13, %s17_s13 }
   0x8   :  { %p1040_p3 = scmp.ne.s32.totalorder %s17_s13, %s1039_s21  ;;  %p1045_p5 = scmp.lt.s32.totalorder %s1039_s21, %s1039_s21 }
   0xa   :  { %p1046_p6 = por %p1045_p5, %p1044_p4 }
   0xc   :  { %p1047_p7 = pnand %p1046_p6, %p1040_p3 }
   0xe   :  { %1050 = shalt.err (!%p1047_p7)
}
   0xf   :  { %s1054_s22 = smov 64   ;;  %s1055_s23 = smov 4  }
  0x10   :  { %22 = dma.hbm_to_vmem [thread:$0]  %s1196_s1, 6144, %s17_s13, [#allocation3], %s1054_s22, %s1054_s22, %s1055_s23  }
  0x11   :  { %1051 = dma.done.wait [#allocation3], 6144  }
  0x12   :  { %1052 = vsyncadd [#allocation3], 4294961152  ;;  %v1056_v0 = vmov 0.0   ;;  %vm1057_vm0 = vmmov 0   ;;  %v979_v1 = vld [vmem:[#allocation2] sm:$0xff]   ;;  %v980_v2 = vld [vmem:[#allocation2 + $0x8] sm:$0xff]   ;;  %v371_v56 = vlaneseq }
  0x13   :  { %854 = vmatprep.subr.bf16.mxu0 %v1056_v0  ;;  %870 = vmatprep.mubr.msk.bf16.mxu0 %vm1057_vm0, %v1056_v0  ;;  %v981_v3 = vld [vmem:[#allocation2 + $0x10] sm:$0xff]   ;;  %v987_v4 = vld [vmem:[#allocation2 + $0x40] sm:$0xff]   ;;  %v982_v5 = vld [vmem:[#allocation2 + $0x18] sm:$0xff]  }
  0x14   :  { %874 = vmatprep.subr.bf16.mxu1 %v1056_v0  ;;  %890 = vmatprep.mubr.msk.bf16.mxu1 %vm1057_vm0, %v1056_v0  ;;  %v988_v6 = vld [vmem:[#allocation2 + $0x48] sm:$0xff]   ;;  %v983_v7 = vld [vmem:[#allocation2 + $0x20] sm:$0xff]   ;;  %v989_v8 = vld [vmem:[#allocation2 + $0x50] sm:$0xff]   ;;  %v372_v57 = vand.u32 127, %v371_v56 }
  0x15   :  { %855 = vmatpush3.bf16.msra.mxu0 %v979_v1  ;;  %875 = vmatpush3.bf16.msra.mxu1 %v987_v4  ;;  %v984_v9 = vld [vmem:[#allocation2 + $0x28] sm:$0xff]   ;;  %v990_v10 = vld [vmem:[#allocation2 + $0x58] sm:$0xff]   ;;  %v985_v11 = vld [vmem:[#allocation2 + $0x30] sm:$0xff]  }
  0x16   :  { %856 = vmatprep.subr.bf16.mxu0 %v1056_v0  ;;  %876 = vmatprep.subr.bf16.mxu1 %v1056_v0  ;;  %v991_v12 = vld [vmem:[#allocation2 + $0x60] sm:$0xff]   ;;  %v986_v13 = vld [vmem:[#allocation2 + $0x38] sm:$0xff]   ;;  %v992_v14 = vld [vmem:[#allocation2 + $0x68] sm:$0xff]   ;;  %vm376_vm1 = vcmp.ge.s32.totalorder %v372_v57, 48  ;;  %vm377_vm2 = vcmp.lt.s32.totalorder %v372_v57, 64  ;;  %vm373_vm3 = vcmp.ge.s32.totalorder %v372_v57, 32 }
  0x17   :  { %v1110_v15 = vld [vmem:[%s1195_s0] sm:$0xf]  ;;  %v993_v16 = vld [vmem:[#allocation2 + $0x70] sm:$0xff]   ;;  %v994_v17 = vld [vmem:[#allocation2 + $0x78] sm:$0xff]   ;;  %vm374_vm6 = vcmp.lt.s32.totalorder %v372_v57, 48 }
  0x18   :  { %v995_v18 = vld [vmem:[#allocation2 + $0x80] sm:$0xff]   ;;  %v996_v19 = vld [vmem:[#allocation2 + $0x88] sm:$0xff]   ;;  %v997_v20 = vld [vmem:[#allocation2 + $0x90] sm:$0xff]  }
  0x19   :  { %857 = vmatpush3.bf16.msra.mxu0 %v980_v2  ;;  %877 = vmatpush3.bf16.msra.mxu1 %v988_v6  ;;  %v998_v21 = vld [vmem:[#allocation2 + $0x98] sm:$0xff]   ;;  %v999_v22 = vld [vmem:[#allocation2 + $0xa0] sm:$0xff]   ;;  %v1000_v23 = vld [vmem:[#allocation2 + $0xa8] sm:$0xff]   ;;  %v383_v6 = vunpack.c.l.bf16 %v1110_v15 }
  0x1a   :  { %858 = vmatprep.subr.bf16.mxu0 %v1056_v0  ;;  %878 = vmatprep.subr.bf16.mxu1 %v1056_v0  ;;  %v741_v24 = vld [vmem:[%s1197_s2] ss:$0 sm:$0xff]  ;;  %v1001_v32 = vld [vmem:[#allocation2 + $0xb0] sm:$0xff]   ;;  %v1002_v33 = vld [vmem:[#allocation2 + $0xb8] sm:$0xff]  }
  0x1b   :  { %v1003_v34 = vld [vmem:[#allocation2 + $0xc0] sm:$0xff]   ;;  %v1004_v35 = vld [vmem:[#allocation2 + $0xc8] sm:$0xff]   ;;  %v1005_v44 = vld [vmem:[#allocation2 + $0xd0] sm:$0xff]  }
  0x1c   :  { %v751_v36 = vld [vmem:[%s1197_s2 + $0x1] ss:$0 sm:$0xff]  ;;  %v1006_v45 = vld [vmem:[#allocation2 + $0xd8] sm:$0xff]   ;;  %v1008_v47 = vld [vmem:[#allocation2 + $0xe8] sm:$0xff]  }
  0x1d   :  { %859 = vmatpush3.bf16.msra.mxu0 %v981_v3  ;;  %879 = vmatpush3.bf16.msra.mxu1 %v989_v8  ;;  %v1007_v46 = vld [vmem:[#allocation2 + $0xe0] sm:$0xff]   ;;  %v1009_v48 = vld [vmem:[#allocation2 + $0xf0] sm:$0xff]   ;;  %v1010_v49 = vld [vmem:[#allocation2 + $0xf8] sm:$0xff]  }
  0x1e   :  { %860 = vmatprep.subr.bf16.mxu0 %v1056_v0  ;;  %880 = vmatprep.subr.bf16.mxu1 %v1056_v0  ;;  %v1011_v50 = vld [vmem:[#allocation2 + $0x100] sm:$0xff]   ;;  %v1012_v51 = vld [vmem:[#allocation2 + $0x108] sm:$0xff]   ;;  %v1013_v52 = vld [vmem:[#allocation2 + $0x110] sm:$0xff]  }
  0x1f   :  { %v1014_v53 = vld [vmem:[#allocation2 + $0x118] sm:$0xff]   ;;  %v1015_v54 = vld [vmem:[#allocation2 + $0x120] sm:$0xff]   ;;  %v1016_v55 = vld [vmem:[#allocation2 + $0x128] sm:$0xff]  }
  0x20   :  { %v761_v58 = vld [vmem:[%s1197_s2 + $0x2] ss:$0 sm:$0xff]  ;;  %vm378_vm4 = vmand %vm376_vm1, %vm377_vm2 }
  0x21   :  { %861 = vmatpush3.bf16.msra.mxu0 %v982_v5  ;;  %881 = vmatpush3.bf16.msra.mxu1 %v990_v10  ;;  %vm1156_vm5 = vmand %vm373_vm3, %vm377_vm2 }
  0x22   :  { %862 = vmatprep.subr.bf16.mxu0 %v1056_v0  ;;  %882 = vmatprep.subr.bf16.mxu1 %v1056_v0  ;;  %vm375_vm7 = vmand %vm373_vm3, %vm374_vm6 }
  0x25   :  { %863 = vmatpush3.bf16.msra.mxu0 %v983_v7  ;;  %883 = vmatpush3.bf16.msra.mxu1 %v991_v12  ;;  %v384_v7 = vsel %vm378_vm4, %v383_v6, 0.0 }
  0x26   :  { %864 = vmatprep.subr.bf16.mxu0 %v1056_v0  ;;  %884 = vmatprep.subr.bf16.mxu1 %v1056_v0 }
  0x29   :  { %865 = vmatpush3.bf16.msra.mxu0 %v984_v9  ;;  %885 = vmatpush3.bf16.msra.mxu1 %v992_v14  ;;  %v1018_v14 = vld [vmem:[#allocation2 + $0x138] sm:$0xff]  }
  0x2a   :  { %866 = vmatprep.subr.bf16.mxu0 %v1056_v0  ;;  %886 = vmatprep.subr.bf16.mxu1 %v1056_v0 }
  0x2d   :  { %867 = vmatpush3.bf16.msra.mxu0 %v985_v11  ;;  %887 = vmatpush3.bf16.msra.mxu1 %v993_v16  ;;  %v1020_v16 = vld [vmem:[#allocation2 + $0x148] sm:$0xff]  }
  0x2e   :  { %868 = vmatprep.subr.bf16.mxu0 %v1056_v0  ;;  %888 = vmatprep.subr.bf16.mxu1 %v1056_v0 }
  0x31   :  { %869 = vmatpush3.bf16.msra.mxu0 %v986_v13  ;;  %889 = vmatpush3.bf16.msra.mxu1 %v994_v17  ;;  %v1017_v13 = vld [vmem:[#allocation2 + $0x130] sm:$0xff]  }
  0x32   :  { %894 = vmatprep.subr.bf16.mxu0 %v1056_v0  ;;  %914 = vmatprep.subr.bf16.mxu1 %v1056_v0  ;;  %v1021_v17 = vld [vmem:[#allocation2 + $0x150] sm:$0xff]  }
  0x34   :  { %871 = vmatmul.mubr.bf16.vlgmr.msra.gmra.mrb[0].mxu0 %v1110_v15  ;;  %v1019_v15 = vld [vmem:[#allocation2 + $0x140] sm:$0xff]  }
  0x35   :  { %910 = vmatprep.mubr.msk.bf16.mxu0 %vm1057_vm0, %v1056_v0  ;;  %895 = vmatpush3.bf16.msra.mxu0 %v995_v18  ;;  %v1022_v18 = vld [vmem:[#allocation2 + $0x158] sm:$0xff]  }
  0x36   :  { %896 = vmatprep.subr.bf16.mxu0 %v1056_v0 }
  0x39   :  { %897 = vmatpush3.bf16.msra.mxu0 %v996_v19  ;;  %v1023_v19 = vld [vmem:[#allocation2 + $0x160] sm:$0xff]  }
  0x3a   :  { %898 = vmatprep.subr.bf16.mxu0 %v1056_v0 }
  0x3d   :  { %899 = vmatpush3.bf16.msra.mxu0 %v997_v20  ;;  %v1024_v20 = vld [vmem:[#allocation2 + $0x168] sm:$0xff]  }
  0x3e   :  { %900 = vmatprep.subr.bf16.mxu0 %v1056_v0 }
  0x41   :  { %901 = vmatpush3.bf16.msra.mxu0 %v998_v21  ;;  %v771_v21 = vld [vmem:[%s1197_s2 + $0x3] ss:$0 sm:$0xff] }
  0x42   :  { %902 = vmatprep.subr.bf16.mxu0 %v1056_v0 }
  0x45   :  { %903 = vmatpush3.bf16.msra.mxu0 %v999_v22 }
  0x46   :  { %904 = vmatprep.subr.bf16.mxu0 %v1056_v0 }
  0x49   :  { %905 = vmatpush3.bf16.msra.mxu0 %v1000_v23 }
  0x4a   :  { %906 = vmatprep.subr.bf16.mxu0 %v1056_v0 }
  0x4d   :  { %907 = vmatpush3.bf16.msra.mxu0 %v1001_v32 }
  0x4e   :  { %908 = vmatprep.subr.bf16.mxu0 %v1056_v0 }
  0x51   :  { %909 = vmatpush3.bf16.msra.mxu0 %v1002_v33 }
  0x52   :  { %934 = vmatprep.subr.bf16.mxu0 %v1056_v0 }
 0x107   :  { %v135_v25 = vpop.f32.mrb[0].mxu0 }
 0x108   :  { %v136_v26 = vadd.f32 %v741_v24, %v135_v25  ;;  %v872_v27 = vpop.f32.mrb[1].mxu0 }
 0x109   :  { %v138_v28 = vpop.f32.mrb[2].mxu0 }
 0x10a   :  { %v141_v29 = vmax.f32 %v136_v26, 0.0  ;;  %v873_v30 = vpop.f32.mrb[3].mxu0 }
 0x10b   :  { %v1026_v30 = vld [vmem:[#allocation2 + $0x178] sm:$0xff]  }
 0x10c   :  { %v142_v31 = vpack.c.bf16 %v141_v29, %v141_v29  ;;  %v1025_v29 = vld [vmem:[#allocation2 + $0x170] sm:$0xff]  }
 0x10e   :  { %891 = vmatmul.mubr.bf16.vlgmr.msra.gmra.mrb[0].mxu1 %v142_v31  ;;  %v781_v31 = vld [vmem:[%s1197_s2 + $0x4] ss:$0 sm:$0xff] }
 0x10f   :  { %930 = vmatprep.mubr.msk.bf16.mxu1 %vm1057_vm0, %v1056_v0  ;;  %915 = vmatpush3.bf16.msra.mxu1 %v1003_v34 }
 0x110   :  { %916 = vmatprep.subr.bf16.mxu1 %v1056_v0 }
 0x113   :  { %917 = vmatpush3.bf16.msra.mxu1 %v1004_v35 }
 0x114   :  { %918 = vmatprep.subr.bf16.mxu1 %v1056_v0 }
 0x117   :  { %919 = vmatpush3.bf16.msra.mxu1 %v1005_v44 }
 0x118   :  { %920 = vmatprep.subr.bf16.mxu1 %v1056_v0 }
 0x11b   :  { %921 = vmatpush3.bf16.msra.mxu1 %v1006_v45 }
 0x11c   :  { %922 = vmatprep.subr.bf16.mxu1 %v1056_v0 }
 0x11f   :  { %923 = vmatpush3.bf16.msra.mxu1 %v1007_v46 }
 0x120   :  { %924 = vmatprep.subr.bf16.mxu1 %v1056_v0 }
 0x123   :  { %925 = vmatpush3.bf16.msra.mxu1 %v1008_v47 }
 0x124   :  { %926 = vmatprep.subr.bf16.mxu1 %v1056_v0 }
 0x127   :  { %927 = vmatpush3.bf16.msra.mxu1 %v1009_v48 }
 0x128   :  { %928 = vmatprep.subr.bf16.mxu1 %v1056_v0 }
 0x12b   :  { %929 = vmatpush3.bf16.msra.mxu1 %v1010_v49 }
 0x12c   :  { %954 = vmatprep.subr.bf16.mxu1 %v1056_v0 }
 0x1e1   :  { %v250_v37 = vpop.f32.mrb[0].mxu1 }
 0x1e2   :  { %v251_v38 = vadd.f32 %v751_v36, %v250_v37  ;;  %v892_v39 = vpop.f32.mrb[1].mxu1 }
 0x1e3   :  { %v253_v40 = vpop.f32.mrb[2].mxu1  ;;  %v791_v39 = vld [vmem:[%s1197_s2 + $0x5] ss:$0 sm:$0xff] }
 0x1e4   :  { %v256_v41 = vmax.f32 %v251_v38, 0.0  ;;  %v893_v42 = vpop.f32.mrb[3].mxu1 }
 0x1e6   :  { %v257_v43 = vpack.c.bf16 %v256_v41, %v256_v41 }
 0x1e8   :  { %911 = vmatmul.mubr.bf16.vlgmr.msra.gmra.mrb[4].mxu0 %v257_v43 }
 0x1e9   :  { %950 = vmatprep.mubr.msk.bf16.mxu0 %vm1057_vm0, %v1056_v0  ;;  %935 = vmatpush3.bf16.msra.mxu0 %v1011_v50 }
 0x1ea   :  { %936 = vmatprep.subr.bf16.mxu0 %v1056_v0 }
 0x1ed   :  { %937 = vmatpush3.bf16.msra.mxu0 %v1012_v51 }
 0x1ee   :  { %938 = vmatprep.subr.bf16.mxu0 %v1056_v0 }
 0x1f1   :  { %939 = vmatpush3.bf16.msra.mxu0 %v1013_v52 }
 0x1f2   :  { %940 = vmatprep.subr.bf16.mxu0 %v1056_v0 }
 0x1f5   :  { %941 = vmatpush3.bf16.msra.mxu0 %v1014_v53 }
 0x1f6   :  { %942 = vmatprep.subr.bf16.mxu0 %v1056_v0 }
 0x1f9   :  { %943 = vmatpush3.bf16.msra.mxu0 %v1015_v54 }
 0x1fa   :  { %944 = vmatprep.subr.bf16.mxu0 %v1056_v0 }
 0x1fd   :  { %945 = vmatpush3.bf16.msra.mxu0 %v1016_v55 }
 0x1fe   :  { %946 = vmatprep.subr.bf16.mxu0 %v1056_v0 }
 0x201   :  { %947 = vmatpush3.bf16.msra.mxu0 %v1017_v13 }
 0x202   :  { %948 = vmatprep.subr.bf16.mxu0 %v1056_v0 }
 0x205   :  { %949 = vmatpush3.bf16.msra.mxu0 %v1018_v14 }
 0x2bb   :  { %v365_v59 = vpop.f32.mrb[4].mxu0 }
 0x2bc   :  { %v1160_v61 = vadd.f32 %v761_v58, %v365_v59  ;;  %v912_v62 = vpop.f32.mrb[5].mxu0 }
 0x2bd   :  { %v368_v63 = vpop.f32.mrb[6].mxu0 }
 0x2be   :  { %v379_v1 = vsel %vm378_vm4, %v1160_v61, 0.0  ;;  %v913_v2 = vpop.f32.mrb[7].mxu0  ;;  %v733_v3 = vsel %vm1156_vm5, %v1160_v61, 0.0  ;;  %v385_v10 = vsel %vm375_vm7, %v1160_v61, 0.0 }
 0x2bf   :  { %v380_v4 = vmul.f32 0.5, %v379_v1 }
 0x2c1   :  { %v381_v5 = vmul.f32 1.442695, %v380_v4 }
 0x2c3   :  { %1027 = vpow2.f32 %v381_v5 }
 0x2cd   :  { %v1028_v8 = vpop.eup %1027 }
 0x2ce   :  { %v386_v9 = vmul.f32 %v1028_v8, %v384_v7 }
 0x2d0   :  { %v387_v11 = vadd.f32 %v386_v9, %v385_v10 }
 0x2d2   :  { %v388_v12 = vpack.c.bf16 %v387_v11, %v387_v11 }
 0x2d4   :  { %931 = vmatmul.mubr.bf16.vlgmr.msra.gmra.mrb[4].mxu1 %v388_v12 }
 0x2d5   :  { %970 = vmatprep.mubr.msk.bf16.mxu1 %vm1057_vm0, %v1056_v0  ;;  %955 = vmatpush3.bf16.msra.mxu1 %v1019_v15 }
 0x2d6   :  { %956 = vmatprep.subr.bf16.mxu1 %v1056_v0 }
 0x2d9   :  { %957 = vmatpush3.bf16.msra.mxu1 %v1020_v16 }
 0x2da   :  { %958 = vmatprep.subr.bf16.mxu1 %v1056_v0 }
 0x2dd   :  { %959 = vmatpush3.bf16.msra.mxu1 %v1021_v17 }
 0x2de   :  { %960 = vmatprep.subr.bf16.mxu1 %v1056_v0 }
 0x2e1   :  { %961 = vmatpush3.bf16.msra.mxu1 %v1022_v18 }
 0x2e2   :  { %962 = vmatprep.subr.bf16.mxu1 %v1056_v0 }
 0x2e5   :  { %963 = vmatpush3.bf16.msra.mxu1 %v1023_v19 }
 0x2e6   :  { %964 = vmatprep.subr.bf16.mxu1 %v1056_v0 }
 0x2e9   :  { %965 = vmatpush3.bf16.msra.mxu1 %v1024_v20 }
 0x2ea   :  { %966 = vmatprep.subr.bf16.mxu1 %v1056_v0 }
 0x2ed   :  { %967 = vmatpush3.bf16.msra.mxu1 %v1025_v29 }
 0x2ee   :  { %968 = vmatprep.subr.bf16.mxu1 %v1056_v0 }
 0x2f1   :  { %969 = vmatpush3.bf16.msra.mxu1 %v1026_v30 }
 0x3a7   :  { %v496_v22 = vpop.f32.mrb[4].mxu1 }
 0x3a8   :  { %v497_v23 = vadd.f32 %v771_v21, %v496_v22  ;;  %v932_v24 = vpop.f32.mrb[5].mxu1 }
 0x3a9   :  { %v499_v25 = vpop.f32.mrb[6].mxu1 }
 0x3aa   :  { %v502_v26 = vmax.f32 %v497_v23, 0.0  ;;  %v933_v27 = vpop.f32.mrb[7].mxu1 }
 0x3ac   :  { %v503_v28 = vpack.c.bf16 %v502_v26, %v502_v26 }
 0x3ae   :  { %951 = vmatmul.mubr.bf16.vlgmr.msra.gmra.mrb[8].mxu0 %v503_v28 }
 0x481   :  { %v611_v32 = vpop.f32.mrb[8].mxu0 }
 0x482   :  { %v612_v33 = vadd.f32 %v781_v31, %v611_v32  ;;  %v952_v34 = vpop.f32.mrb[9].mxu0 }
 0x483   :  { %v614_v35 = vpop.f32.mrb[10].mxu0 }
 0x484   :  { %v617_v36 = vmax.f32 %v612_v33, 0.0  ;;  %v953_v37 = vpop.f32.mrb[11].mxu0 }
 0x486   :  { %v618_v38 = vpack.c.bf16 %v617_v36, %v617_v36 }
 0x488   :  { %971 = vmatmul.mubr.bf16.vlgmr.msra.gmra.mrb[8].mxu1 %v618_v38 }
 0x55b   :  { %v726_v40 = vpop.f32.mrb[8].mxu1 }
 0x55c   :  { %v727_v0 = vadd.f32 %v791_v39, %v726_v40  ;;  %v972_v41 = vpop.f32.mrb[9].mxu1 }
 0x55d   :  { %v729_v42 = vpop.f32.mrb[10].mxu1 }
 0x55e   :  { %v734_v43 = vadd.f32 %v733_v3, %v727_v0  ;;  %v973_v44 = vpop.f32.mrb[11].mxu1 }
 0x560   :  { %735 = vst [vmem:[%s1198_s3] sm:$0xff] %v734_v43 }
 0x561   :  { %740 = vsyncpa [#allocation3], 1 }

</bundles_post_ra>
